<compile_context>
chip_gen: v5e
topology: v5e:2x2
jax: 0.10.0
libtpu: 0.0.40
codegen_flags: <defaults>
</compile_context>

<pallas_src>
import numpy as np
import jax
import jax.numpy as jnp
from jax.experimental import pallas as pl
from jax.experimental.pallas import tpu as pltpu

T, B, D, H = 8, 4, 16, 32          # seq len, batch, input_size, hidden_size
B_PAD = 8                          # batch padded to the sublane width
NDIR = 2                           # bidirectional
NUM_CLASSES = 2


# ----------------------------- Pallas kernel ------------------------------ #

def rnn_kernel(x_ref, mask_ref, wih_ref, whh_ref, b_ref,
               hinit_ref, cinit_ref, out_ref):
    """One LSTM direction per grid step (grid=(2,)).

    Direction 1's x/mask are time-reversed by the wrapper, so the recurrence is
    always forward-in-time here; the wrapper flips that direction's output back.
    """
    # ---- hoisted off the serial critical path -----------------------------
    whh = whh_ref[0]                                              # (H, 4H)
    h = jnp.broadcast_to(hinit_ref[0], (B_PAD, H)).astype(jnp.float32)
    c = jnp.broadcast_to(cinit_ref[0], (B_PAD, H)).astype(jnp.float32)
    # mask broadcast hoisted once: (T*B_PAD, H) boolean
    m_all = jnp.broadcast_to(mask_ref[0], (T * B_PAD, H)) != 0.0
    # input projection for all timesteps in one MXU matmul; bias folded in
    gx = (jnp.dot(x_ref[0], wih_ref[0], preferred_element_type=jnp.float32)
          + b_ref[0])                                             # (T*B_PAD, 4H)

    # ---- recurrence, fully unrolled (T is small and static) ---------------
    hs = []
    for t in range(T):
        rows = slice(t * B_PAD, (t + 1) * B_PAD)
        gates = jnp.dot(h, whh, preferred_element_type=jnp.float32) + gx[rows]
        i_g = jax.nn.sigmoid(gates[:, 0 * H:1 * H])
        f_g = jax.nn.sigmoid(gates[:, 1 * H:2 * H])
        g_g = jnp.tanh(gates[:, 2 * H:3 * H])
        o_g = jax.nn.sigmoid(gates[:, 3 * H:4 * H])
        c_new = f_g * c + i_g * g_g
        h_new = o_g * jnp.tanh(c_new)
        m_t = m_all[rows]                                         # (B_PAD, H)
        # packed-sequence semantics: past the sequence length the state is
        # frozen and the padded output is zero (pad_packed_sequence).
        h = jnp.where(m_t, h_new, h)
        c = jnp.where(m_t, c_new, c)
        hs.append(jnp.where(m_t, h_new, jnp.zeros_like(h_new)))

    # lane-dense output slab: (B_PAD, T*H) = (8, 256) -> unmasked full stores
    out_ref[0] = jnp.concatenate(hs, axis=1)


def _dir_spec(shape):
    """Block = one direction slice (1, rest...), indexed by the grid axis."""
    rest = (0,) * (len(shape) - 1)
    return pl.BlockSpec((1,) + tuple(shape[1:]), lambda g: (g,) + rest)


# ------------------------------- wrapper ----------------------------------- #

def rnn_forward(x, params):
    # lens = inputs.any(2).sum(0)
    lens = jnp.any(x != 0, axis=2).sum(axis=0).astype(jnp.int32)      # (B,)
    order = jnp.flip(jnp.argsort(lens))                               # descending
    order_r = order[order]            # module uses order[order], not the inverse
    x_sorted = x[:, order, :].astype(jnp.float32)
    lens_sorted = lens[order]

    # pad batch to the sublane width; padded rows have length 0 (masked out)
    x_pad = jnp.zeros((T, B_PAD, D), jnp.float32).at[:, :B, :].set(x_sorted)
    lens_pad = jnp.zeros((B_PAD,), jnp.int32).at[:B].set(lens_sorted)
    mask = (jnp.arange(T)[:, None] < lens_pad[None, :]).astype(jnp.float32)  # (T, B_PAD)

    # per-direction stacking; direction 1 consumes time-reversed x and mask
    x_dirs = jnp.stack([x_pad.reshape(T * B_PAD, D),
                        x_pad[::-1].reshape(T * B_PAD, D)], axis=0)       # (2, T*B_PAD, D)
    mask_dirs = jnp.stack([mask.reshape(T * B_PAD, 1),
                           mask[::-1].reshape(T * B_PAD, 1)], axis=0)     # (2, T*B_PAD, 1)

    wih = jnp.stack([params["w_ih_f"].T, params["w_ih_b"].T], axis=0)     # (2, D, 4H)
    whh = jnp.stack([params["w_hh_f"].T, params["w_hh_b"].T], axis=0)     # (2, H, 4H)
    bias = jnp.stack([(params["b_ih_f"] + params["b_hh_f"])[None, :],
                      (params["b_ih_b"] + params["b_hh_b"])[None, :]],
                     axis=0)                                              # (2, 1, 4H)
    # module passes (c0, h0) where nn.LSTM expects (h_0, c_0) -> swap here
    h_init = params["c0"]            # (2, 1, H)
    c_init = params["h0"]            # (2, 1, H)

    ins = [x_dirs, mask_dirs, wih, whh, bias, h_init, c_init]

    out = pl.pallas_call(
        rnn_kernel,
        out_shape=jax.ShapeDtypeStruct((NDIR, B_PAD, T * H), jnp.float32),
        grid=(NDIR,),
        in_specs=[_dir_spec(a.shape) for a in ins],
        out_specs=_dir_spec((NDIR, B_PAD, T * H)),
        compiler_params=pltpu.CompilerParams(
            dimension_semantics=("parallel",)),     # 2 TCs on v7x; loop elsewhere
    )(*ins)

    out = out.reshape(NDIR, B_PAD, T, H)[:, :B]             # (2, B, T, H)
    summed = out[0] + out[1][:, ::-1, :]                    # undo dir-1 time flip
    prelogits = summed[order_r]                             # (B, T, H)

    # tiny heads left to XLA (keeps the kernel output lane-dense)
    logits = prelogits @ params["w_log"].T + params["b_log"]       # (B, T, 2)
    precounts = jnp.sum(prelogits, axis=1)                         # (B, H)
    counts = precounts @ params["w_cnt"].T + params["b_cnt"]       # (B, 1)
    return logits, counts


# ------------------------- deterministic parameters ------------------------ #

def make_params(key):
    ks = jax.random.split(key, 14)
    s = 1.0 / np.sqrt(H)
    u = lambda k, shape: jax.random.uniform(k, shape, jnp.float32, -s, s)
    return {
        "w_ih_f": u(ks[0], (4 * H, D)), "w_hh_f": u(ks[1], (4 * H, H)),
        "b_ih_f": u(ks[2], (4 * H,)),   "b_hh_f": u(ks[3], (4 * H,)),
        "w_ih_b": u(ks[4], (4 * H, D)), "w_hh_b": u(ks[5], (4 * H, H)),
        "b_ih_b": u(ks[6], (4 * H,)),   "b_hh_b": u(ks[7], (4 * H,)),
        "w_log":  u(ks[8], (NUM_CLASSES, H)), "b_log": u(ks[9], (NUM_CLASSES,)),
        "w_cnt":  u(ks[10], (1, H)),          "b_cnt": u(ks[11], (1,)),
        "c0": jax.random.normal(ks[12], (2, 1, H), jnp.float32),
        "h0": jax.random.normal(ks[13], (2, 1, H), jnp.float32),
    }


# --------------------------- numpy reference ------------------------------- #

def _sigmoid(z):
    return 1.0 / (1.0 + np.exp(-z))


def _lstm_dir_ref(xs, mask, w_ih, w_hh, b, h0, c0, reverse):
    h = np.repeat(h0, xs.shape[1], axis=0)
    c = np.repeat(c0, xs.shape[1], axis=0)
    out = np.zeros((T, B, H), np.float32)
    steps = range(T - 1, -1, -1) if reverse else range(T)
    for t in steps:
        m = mask[t][:, None]
        g = xs[t] @ w_ih.T + h @ w_hh.T + b
        i = _sigmoid(g[:, :H]); f = _sigmoid(g[:, H:2 * H])
        gg = np.tanh(g[:, 2 * H:3 * H]); o = _sigmoid(g[:, 3 * H:])
        c_new = f * c + i * gg
        h_new = o * np.tanh(c_new)
        h = m * h_new + (1 - m) * h
        c = m * c_new + (1 - m) * c
        out[t] = m * h_new
    return out


def rnn_reference(x, params):
    xn = np.asarray(x, np.float32)
    p = {k: np.asarray(v, np.float32) for k, v in params.items()}
    lens = (xn != 0).any(axis=2).sum(axis=0)
    order = np.asarray(jnp.flip(jnp.argsort(jnp.asarray(lens))))
    order_r = order[order]
    xs = xn[:, order, :]
    ls = lens[order]
    mask = (np.arange(T)[:, None] < ls[None, :]).astype(np.float32)
    out_f = _lstm_dir_ref(xs, mask, p["w_ih_f"], p["w_hh_f"],
                          p["b_ih_f"] + p["b_hh_f"], p["c0"][0], p["h0"][0], False)
    out_b = _lstm_dir_ref(xs, mask, p["w_ih_b"], p["w_hh_b"],
                          p["b_ih_b"] + p["b_hh_b"], p["c0"][1], p["h0"][1], True)
    out = out_f + out_b
    prelogits = np.transpose(out[:, order_r, :], (1, 0, 2))        # (B, T, H)
    logits = prelogits @ p["w_log"].T + p["b_log"]
    precounts = prelogits.sum(axis=1)
    counts = precounts @ p["w_cnt"].T + p["b_cnt"]
    return logits, counts


if __name__ == "__main__":
    key = jax.random.PRNGKey(0)
    kx, kp = jax.random.split(key)
    x = jax.random.normal(kx, (T, B, D), jnp.float32)
    # variable sequence lengths (longest == T so padded output length is T)
    seq_lens = np.array([T, 5, 3, 7], np.int32)
    valid = jnp.asarray(np.arange(T)[:, None] < seq_lens[None, :])[:, :, None]
    x = jnp.where(valid, x, 0.0)
    params = make_params(kp)

    logits, counts = rnn_forward(x, params)
    jax.block_until_ready((logits, counts))

    ref_logits, ref_counts = rnn_reference(x, params)
    np.testing.assert_allclose(np.asarray(logits), ref_logits, rtol=5e-3, atol=5e-3)
    np.testing.assert_allclose(np.asarray(counts), ref_counts, rtol=5e-3, atol=5e-3)
    assert logits.shape == (B, T, NUM_CLASSES) and counts.shape == (B, 1)
    print("KERNEL_OK")
</pallas_src>

<mosaic_0001>
module attributes {stable_mosaic.version = 11 : i64} {
  func.func @rnn_kernel(%arg0: i32, %arg1: memref<1x64x16xf32, #tpu.memory_space<vmem>>, %arg2: memref<1x64x1xf32, #tpu.memory_space<vmem>>, %arg3: memref<1x16x128xf32, #tpu.memory_space<vmem>>, %arg4: memref<1x32x128xf32, #tpu.memory_space<vmem>>, %arg5: memref<1x1x128xf32, #tpu.memory_space<vmem>>, %arg6: memref<1x1x32xf32, #tpu.memory_space<vmem>>, %arg7: memref<1x1x32xf32, #tpu.memory_space<vmem>>, %arg8: memref<1x8x256xf32, #tpu.memory_space<vmem>>) attributes {dimension_semantics = [#tpu.dimension_semantics<parallel>], iteration_bounds = array<i64: 2>, scalar_prefetch = 0 : i64, scratch_operands = 0 : i64, tpu.core_type = #tpu.core_type<tc>, window_params = [{transform_indices = @transform_0, window_bounds = array<i64: 1, 64, 16>}, {transform_indices = @transform_1, window_bounds = array<i64: 1, 64, 1>}, {transform_indices = @transform_2, window_bounds = array<i64: 1, 16, 128>}, {transform_indices = @transform_3, window_bounds = array<i64: 1, 32, 128>}, {transform_indices = @transform_4, window_bounds = array<i64: 1, 1, 128>}, {transform_indices = @transform_5, window_bounds = array<i64: 1, 1, 32>}, {transform_indices = @transform_6, window_bounds = array<i64: 1, 1, 32>}, {transform_indices = @transform_7, window_bounds = array<i64: 1, 8, 256>}]} {
    %c0 = arith.constant 0 : index
    %c0_0 = arith.constant 0 : index
    %c0_1 = arith.constant 0 : index
    %0 = vector.load %arg4[%c0, %c0_0, %c0_1] : memref<1x32x128xf32, #tpu.memory_space<vmem>>, vector<1x32x128xf32>
    %1 = vector.shape_cast %0 : vector<1x32x128xf32> to vector<32x128xf32>
    %c0_2 = arith.constant 0 : index
    %c0_3 = arith.constant 0 : index
    %c0_4 = arith.constant 0 : index
    %2 = vector.load %arg6[%c0_2, %c0_3, %c0_4] : memref<1x1x32xf32, #tpu.memory_space<vmem>>, vector<1x1x32xf32>
    %3 = vector.shape_cast %2 : vector<1x1x32xf32> to vector<1x32xf32>
    %4 = vector.shape_cast %3 : vector<1x32xf32> to vector<1x32xf32>
    %5 = vector.broadcast %4 : vector<1x32xf32> to vector<8x32xf32>
    %c0_5 = arith.constant 0 : index
    %c0_6 = arith.constant 0 : index
    %c0_7 = arith.constant 0 : index
    %6 = vector.load %arg7[%c0_5, %c0_6, %c0_7] : memref<1x1x32xf32, #tpu.memory_space<vmem>>, vector<1x1x32xf32>
    %7 = vector.shape_cast %6 : vector<1x1x32xf32> to vector<1x32xf32>
    %8 = vector.shape_cast %7 : vector<1x32xf32> to vector<1x32xf32>
    %9 = vector.broadcast %8 : vector<1x32xf32> to vector<8x32xf32>
    %c0_8 = arith.constant 0 : index
    %c0_9 = arith.constant 0 : index
    %c0_10 = arith.constant 0 : index
    %10 = vector.load %arg2[%c0_8, %c0_9, %c0_10] : memref<1x64x1xf32, #tpu.memory_space<vmem>>, vector<1x64x1xf32>
    %11 = vector.shape_cast %10 : vector<1x64x1xf32> to vector<64x1xf32>
    %12 = vector.shape_cast %11 : vector<64x1xf32> to vector<64x1xf32>
    %13 = vector.broadcast %12 : vector<64x1xf32> to vector<64x32xf32>
    %cst = arith.constant 0.000000e+00 : f32
    %14 = vector.broadcast %cst : f32 to vector<64x32xf32>
    %15 = arith.cmpf one, %13, %14 : vector<64x32xf32>
    %c0_11 = arith.constant 0 : index
    %c0_12 = arith.constant 0 : index
    %c0_13 = arith.constant 0 : index
    %16 = vector.load %arg1[%c0_11, %c0_12, %c0_13] : memref<1x64x16xf32, #tpu.memory_space<vmem>>, vector<1x64x16xf32>
    %17 = vector.shape_cast %16 : vector<1x64x16xf32> to vector<64x16xf32>
    %c0_14 = arith.constant 0 : index
    %c0_15 = arith.constant 0 : index
    %c0_16 = arith.constant 0 : index
    %18 = vector.load %arg3[%c0_14, %c0_15, %c0_16] : memref<1x16x128xf32, #tpu.memory_space<vmem>>, vector<1x16x128xf32>
    %19 = vector.shape_cast %18 : vector<1x16x128xf32> to vector<16x128xf32>
    %cst_17 = arith.constant dense<0.000000e+00> : vector<64x128xf32>
    %20 = tpu.matmul %17, %19, %cst_17 {dimension_numbers = #tpu.dot_dimension_numbers<[1], [0], [0], [1], [0, 0, 1, 1], [], []>} : vector<64x16xf32>, vector<16x128xf32>, vector<64x128xf32> -> vector<64x128xf32>
    %c0_18 = arith.constant 0 : index
    %c0_19 = arith.constant 0 : index
    %c0_20 = arith.constant 0 : index
    %21 = vector.load %arg5[%c0_18, %c0_19, %c0_20] : memref<1x1x128xf32, #tpu.memory_space<vmem>>, vector<1x1x128xf32>
    %22 = vector.shape_cast %21 : vector<1x1x128xf32> to vector<1x128xf32>
    %23 = vector.broadcast %22 : vector<1x128xf32> to vector<64x128xf32>
    %24 = arith.addf %20, %23 : vector<64x128xf32>
    %cst_21 = arith.constant dense<0.000000e+00> : vector<8x128xf32>
    %25 = tpu.matmul %5, %1, %cst_21 {dimension_numbers = #tpu.dot_dimension_numbers<[1], [0], [0], [1], [0, 0, 1, 1], [], []>} : vector<8x32xf32>, vector<32x128xf32>, vector<8x128xf32> -> vector<8x128xf32>
    %26 = vector.extract_strided_slice %24 {offsets = [0, 0], sizes = [8, 128], strides = [1, 1]} : vector<64x128xf32> to vector<8x128xf32>
    %27 = arith.addf %25, %26 : vector<8x128xf32>
    %28 = vector.extract_strided_slice %27 {offsets = [0, 0], sizes = [8, 32], strides = [1, 1]} : vector<8x128xf32> to vector<8x32xf32>
    %29 = arith.negf %28 : vector<8x32xf32>
    %30 = math.exp %29 : vector<8x32xf32>
    %cst_22 = arith.constant 1.000000e+00 : f32
    %31 = vector.broadcast %cst_22 : f32 to vector<8x32xf32>
    %32 = arith.addf %31, %30 : vector<8x32xf32>
    %33 = arith.divf %31, %32 : vector<8x32xf32>
    %34 = vector.extract_strided_slice %27 {offsets = [0, 32], sizes = [8, 32], strides = [1, 1]} : vector<8x128xf32> to vector<8x32xf32>
    %35 = arith.negf %34 : vector<8x32xf32>
    %36 = math.exp %35 : vector<8x32xf32>
    %cst_23 = arith.constant 1.000000e+00 : f32
    %37 = vector.broadcast %cst_23 : f32 to vector<8x32xf32>
    %38 = arith.addf %37, %36 : vector<8x32xf32>
    %39 = arith.divf %37, %38 : vector<8x32xf32>
    %40 = vector.extract_strided_slice %27 {offsets = [0, 64], sizes = [8, 32], strides = [1, 1]} : vector<8x128xf32> to vector<8x32xf32>
    %41 = math.tanh %40 : vector<8x32xf32>
    %42 = vector.extract_strided_slice %27 {offsets = [0, 96], sizes = [8, 32], strides = [1, 1]} : vector<8x128xf32> to vector<8x32xf32>
    %43 = arith.negf %42 : vector<8x32xf32>
    %44 = math.exp %43 : vector<8x32xf32>
    %cst_24 = arith.constant 1.000000e+00 : f32
    %45 = vector.broadcast %cst_24 : f32 to vector<8x32xf32>
    %46 = arith.addf %45, %44 : vector<8x32xf32>
    %47 = arith.divf %45, %46 : vector<8x32xf32>
    %48 = arith.mulf %39, %9 : vector<8x32xf32>
    %49 = arith.mulf %33, %41 : vector<8x32xf32>
    %50 = arith.addf %48, %49 : vector<8x32xf32>
    %51 = math.tanh %50 : vector<8x32xf32>
    %52 = arith.mulf %47, %51 : vector<8x32xf32>
    %53 = vector.extract_strided_slice %15 {offsets = [0, 0], sizes = [8, 32], strides = [1, 1]} : vector<64x32xi1> to vector<8x32xi1>
    %54 = arith.select %53, %52, %5 : vector<8x32xi1>, vector<8x32xf32>
    %55 = arith.select %53, %50, %9 : vector<8x32xi1>, vector<8x32xf32>
    %cst_25 = arith.constant 0.000000e+00 : f32
    %56 = vector.broadcast %cst_25 : f32 to vector<8x32xf32>
    %57 = arith.select %53, %52, %56 : vector<8x32xi1>, vector<8x32xf32>
    %cst_26 = arith.constant dense<0.000000e+00> : vector<8x128xf32>
    %58 = tpu.matmul %54, %1, %cst_26 {dimension_numbers = #tpu.dot_dimension_numbers<[1], [0], [0], [1], [0, 0, 1, 1], [], []>} : vector<8x32xf32>, vector<32x128xf32>, vector<8x128xf32> -> vector<8x128xf32>
    %59 = vector.extract_strided_slice %24 {offsets = [8, 0], sizes = [8, 128], strides = [1, 1]} : vector<64x128xf32> to vector<8x128xf32>
    %60 = arith.addf %58, %59 : vector<8x128xf32>
    %61 = vector.extract_strided_slice %60 {offsets = [0, 0], sizes = [8, 32], strides = [1, 1]} : vector<8x128xf32> to vector<8x32xf32>
    %62 = arith.negf %61 : vector<8x32xf32>
    %63 = math.exp %62 : vector<8x32xf32>
    %cst_27 = arith.constant 1.000000e+00 : f32
    %64 = vector.broadcast %cst_27 : f32 to vector<8x32xf32>
    %65 = arith.addf %64, %63 : vector<8x32xf32>
    %66 = arith.divf %64, %65 : vector<8x32xf32>
    %67 = vector.extract_strided_slice %60 {offsets = [0, 32], sizes = [8, 32], strides = [1, 1]} : vector<8x128xf32> to vector<8x32xf32>
    %68 = arith.negf %67 : vector<8x32xf32>
    %69 = math.exp %68 : vector<8x32xf32>
    %cst_28 = arith.constant 1.000000e+00 : f32
    %70 = vector.broadcast %cst_28 : f32 to vector<8x32xf32>
    %71 = arith.addf %70, %69 : vector<8x32xf32>
    %72 = arith.divf %70, %71 : vector<8x32xf32>
    %73 = vector.extract_strided_slice %60 {offsets = [0, 64], sizes = [8, 32], strides = [1, 1]} : vector<8x128xf32> to vector<8x32xf32>
    %74 = math.tanh %73 : vector<8x32xf32>
    %75 = vector.extract_strided_slice %60 {offsets = [0, 96], sizes = [8, 32], strides = [1, 1]} : vector<8x128xf32> to vector<8x32xf32>
    %76 = arith.negf %75 : vector<8x32xf32>
    %77 = math.exp %76 : vector<8x32xf32>
    %cst_29 = arith.constant 1.000000e+00 : f32
    %78 = vector.broadcast %cst_29 : f32 to vector<8x32xf32>
    %79 = arith.addf %78, %77 : vector<8x32xf32>
    %80 = arith.divf %78, %79 : vector<8x32xf32>
    %81 = arith.mulf %72, %55 : vector<8x32xf32>
    %82 = arith.mulf %66, %74 : vector<8x32xf32>
    %83 = arith.addf %81, %82 : vector<8x32xf32>
    %84 = math.tanh %83 : vector<8x32xf32>
    %85 = arith.mulf %80, %84 : vector<8x32xf32>
    %86 = vector.extract_strided_slice %15 {offsets = [8, 0], sizes = [8, 32], strides = [1, 1]} : vector<64x32xi1> to vector<8x32xi1>
    %87 = arith.select %86, %85, %54 : vector<8x32xi1>, vector<8x32xf32>
    %88 = arith.select %86, %83, %55 : vector<8x32xi1>, vector<8x32xf32>
    %cst_30 = arith.constant 0.000000e+00 : f32
    %89 = vector.broadcast %cst_30 : f32 to vector<8x32xf32>
    %90 = arith.select %86, %85, %89 : vector<8x32xi1>, vector<8x32xf32>
    %cst_31 = arith.constant dense<0.000000e+00> : vector<8x128xf32>
    %91 = tpu.matmul %87, %1, %cst_31 {dimension_numbers = #tpu.dot_dimension_numbers<[1], [0], [0], [1], [0, 0, 1, 1], [], []>} : vector<8x32xf32>, vector<32x128xf32>, vector<8x128xf32> -> vector<8x128xf32>
    %92 = vector.extract_strided_slice %24 {offsets = [16, 0], sizes = [8, 128], strides = [1, 1]} : vector<64x128xf32> to vector<8x128xf32>
    %93 = arith.addf %91, %92 : vector<8x128xf32>
    %94 = vector.extract_strided_slice %93 {offsets = [0, 0], sizes = [8, 32], strides = [1, 1]} : vector<8x128xf32> to vector<8x32xf32>
    %95 = arith.negf %94 : vector<8x32xf32>
    %96 = math.exp %95 : vector<8x32xf32>
    %cst_32 = arith.constant 1.000000e+00 : f32
    %97 = vector.broadcast %cst_32 : f32 to vector<8x32xf32>
    %98 = arith.addf %97, %96 : vector<8x32xf32>
    %99 = arith.divf %97, %98 : vector<8x32xf32>
    %100 = vector.extract_strided_slice %93 {offsets = [0, 32], sizes = [8, 32], strides = [1, 1]} : vector<8x128xf32> to vector<8x32xf32>
    %101 = arith.negf %100 : vector<8x32xf32>
    %102 = math.exp %101 : vector<8x32xf32>
    %cst_33 = arith.constant 1.000000e+00 : f32
    %103 = vector.broadcast %cst_33 : f32 to vector<8x32xf32>
    %104 = arith.addf %103, %102 : vector<8x32xf32>
    %105 = arith.divf %103, %104 : vector<8x32xf32>
    %106 = vector.extract_strided_slice %93 {offsets = [0, 64], sizes = [8, 32], strides = [1, 1]} : vector<8x128xf32> to vector<8x32xf32>
    %107 = math.tanh %106 : vector<8x32xf32>
    %108 = vector.extract_strided_slice %93 {offsets = [0, 96], sizes = [8, 32], strides = [1, 1]} : vector<8x128xf32> to vector<8x32xf32>
    %109 = arith.negf %108 : vector<8x32xf32>
    %110 = math.exp %109 : vector<8x32xf32>
    %cst_34 = arith.constant 1.000000e+00 : f32
    %111 = vector.broadcast %cst_34 : f32 to vector<8x32xf32>
    %112 = arith.addf %111, %110 : vector<8x32xf32>
    %113 = arith.divf %111, %112 : vector<8x32xf32>
    %114 = arith.mulf %105, %88 : vector<8x32xf32>
    %115 = arith.mulf %99, %107 : vector<8x32xf32>
    %116 = arith.addf %114, %115 : vector<8x32xf32>
    %117 = math.tanh %116 : vector<8x32xf32>
    %118 = arith.mulf %113, %117 : vector<8x32xf32>
    %119 = vector.extract_strided_slice %15 {offsets = [16, 0], sizes = [8, 32], strides = [1, 1]} : vector<64x32xi1> to vector<8x32xi1>
    %120 = arith.select %119, %118, %87 : vector<8x32xi1>, vector<8x32xf32>
    %121 = arith.select %119, %116, %88 : vector<8x32xi1>, vector<8x32xf32>
    %cst_35 = arith.constant 0.000000e+00 : f32
    %122 = vector.broadcast %cst_35 : f32 to vector<8x32xf32>
    %123 = arith.select %119, %118, %122 : vector<8x32xi1>, vector<8x32xf32>
    %cst_36 = arith.constant dense<0.000000e+00> : vector<8x128xf32>
    %124 = tpu.matmul %120, %1, %cst_36 {dimension_numbers = #tpu.dot_dimension_numbers<[1], [0], [0], [1], [0, 0, 1, 1], [], []>} : vector<8x32xf32>, vector<32x128xf32>, vector<8x128xf32> -> vector<8x128xf32>
    %125 = vector.extract_strided_slice %24 {offsets = [24, 0], sizes = [8, 128], strides = [1, 1]} : vector<64x128xf32> to vector<8x128xf32>
    %126 = arith.addf %124, %125 : vector<8x128xf32>
    %127 = vector.extract_strided_slice %126 {offsets = [0, 0], sizes = [8, 32], strides = [1, 1]} : vector<8x128xf32> to vector<8x32xf32>
    %128 = arith.negf %127 : vector<8x32xf32>
    %129 = math.exp %128 : vector<8x32xf32>
    %cst_37 = arith.constant 1.000000e+00 : f32
    %130 = vector.broadcast %cst_37 : f32 to vector<8x32xf32>
    %131 = arith.addf %130, %129 : vector<8x32xf32>
    %132 = arith.divf %130, %131 : vector<8x32xf32>
    %133 = vector.extract_strided_slice %126 {offsets = [0, 32], sizes = [8, 32], strides = [1, 1]} : vector<8x128xf32> to vector<8x32xf32>
    %134 = arith.negf %133 : vector<8x32xf32>
    %135 = math.exp %134 : vector<8x32xf32>
    %cst_38 = arith.constant 1.000000e+00 : f32
    %136 = vector.broadcast %cst_38 : f32 to vector<8x32xf32>
    %137 = arith.addf %136, %135 : vector<8x32xf32>
    %138 = arith.divf %136, %137 : vector<8x32xf32>
    %139 = vector.extract_strided_slice %126 {offsets = [0, 64], sizes = [8, 32], strides = [1, 1]} : vector<8x128xf32> to vector<8x32xf32>
    %140 = math.tanh %139 : vector<8x32xf32>
    %141 = vector.extract_strided_slice %126 {offsets = [0, 96], sizes = [8, 32], strides = [1, 1]} : vector<8x128xf32> to vector<8x32xf32>
    %142 = arith.negf %141 : vector<8x32xf32>
    %143 = math.exp %142 : vector<8x32xf32>
    %cst_39 = arith.constant 1.000000e+00 : f32
    %144 = vector.broadcast %cst_39 : f32 to vector<8x32xf32>
    %145 = arith.addf %144, %143 : vector<8x32xf32>
    %146 = arith.divf %144, %145 : vector<8x32xf32>
    %147 = arith.mulf %138, %121 : vector<8x32xf32>
    %148 = arith.mulf %132, %140 : vector<8x32xf32>
    %149 = arith.addf %147, %148 : vector<8x32xf32>
    %150 = math.tanh %149 : vector<8x32xf32>
    %151 = arith.mulf %146, %150 : vector<8x32xf32>
    %152 = vector.extract_strided_slice %15 {offsets = [24, 0], sizes = [8, 32], strides = [1, 1]} : vector<64x32xi1> to vector<8x32xi1>
    %153 = arith.select %152, %151, %120 : vector<8x32xi1>, vector<8x32xf32>
    %154 = arith.select %152, %149, %121 : vector<8x32xi1>, vector<8x32xf32>
    %cst_40 = arith.constant 0.000000e+00 : f32
    %155 = vector.broadcast %cst_40 : f32 to vector<8x32xf32>
    %156 = arith.select %152, %151, %155 : vector<8x32xi1>, vector<8x32xf32>
    %cst_41 = arith.constant dense<0.000000e+00> : vector<8x128xf32>
    %157 = tpu.matmul %153, %1, %cst_41 {dimension_numbers = #tpu.dot_dimension_numbers<[1], [0], [0], [1], [0, 0, 1, 1], [], []>} : vector<8x32xf32>, vector<32x128xf32>, vector<8x128xf32> -> vector<8x128xf32>
    %158 = vector.extract_strided_slice %24 {offsets = [32, 0], sizes = [8, 128], strides = [1, 1]} : vector<64x128xf32> to vector<8x128xf32>
    %159 = arith.addf %157, %158 : vector<8x128xf32>
    %160 = vector.extract_strided_slice %159 {offsets = [0, 0], sizes = [8, 32], strides = [1, 1]} : vector<8x128xf32> to vector<8x32xf32>
    %161 = arith.negf %160 : vector<8x32xf32>
    %162 = math.exp %161 : vector<8x32xf32>
    %cst_42 = arith.constant 1.000000e+00 : f32
    %163 = vector.broadcast %cst_42 : f32 to vector<8x32xf32>
    %164 = arith.addf %163, %162 : vector<8x32xf32>
    %165 = arith.divf %163, %164 : vector<8x32xf32>
    %166 = vector.extract_strided_slice %159 {offsets = [0, 32], sizes = [8, 32], strides = [1, 1]} : vector<8x128xf32> to vector<8x32xf32>
    %167 = arith.negf %166 : vector<8x32xf32>
    %168 = math.exp %167 : vector<8x32xf32>
    %cst_43 = arith.constant 1.000000e+00 : f32
    %169 = vector.broadcast %cst_43 : f32 to vector<8x32xf32>
    %170 = arith.addf %169, %168 : vector<8x32xf32>
    %171 = arith.divf %169, %170 : vector<8x32xf32>
    %172 = vector.extract_strided_slice %159 {offsets = [0, 64], sizes = [8, 32], strides = [1, 1]} : vector<8x128xf32> to vector<8x32xf32>
    %173 = math.tanh %172 : vector<8x32xf32>
    %174 = vector.extract_strided_slice %159 {offsets = [0, 96], sizes = [8, 32], strides = [1, 1]} : vector<8x128xf32> to vector<8x32xf32>
    %175 = arith.negf %174 : vector<8x32xf32>
    %176 = math.exp %175 : vector<8x32xf32>
    %cst_44 = arith.constant 1.000000e+00 : f32
    %177 = vector.broadcast %cst_44 : f32 to vector<8x32xf32>
    %178 = arith.addf %177, %176 : vector<8x32xf32>
    %179 = arith.divf %177, %178 : vector<8x32xf32>
    %180 = arith.mulf %171, %154 : vector<8x32xf32>
    %181 = arith.mulf %165, %173 : vector<8x32xf32>
    %182 = arith.addf %180, %181 : vector<8x32xf32>
    %183 = math.tanh %182 : vector<8x32xf32>
    %184 = arith.mulf %179, %183 : vector<8x32xf32>
    %185 = vector.extract_strided_slice %15 {offsets = [32, 0], sizes = [8, 32], strides = [1, 1]} : vector<64x32xi1> to vector<8x32xi1>
    %186 = arith.select %185, %184, %153 : vector<8x32xi1>, vector<8x32xf32>
    %187 = arith.select %185, %182, %154 : vector<8x32xi1>, vector<8x32xf32>
    %cst_45 = arith.constant 0.000000e+00 : f32
    %188 = vector.broadcast %cst_45 : f32 to vector<8x32xf32>
    %189 = arith.select %185, %184, %188 : vector<8x32xi1>, vector<8x32xf32>
    %cst_46 = arith.constant dense<0.000000e+00> : vector<8x128xf32>
    %190 = tpu.matmul %186, %1, %cst_46 {dimension_numbers = #tpu.dot_dimension_numbers<[1], [0], [0], [1], [0, 0, 1, 1], [], []>} : vector<8x32xf32>, vector<32x128xf32>, vector<8x128xf32> -> vector<8x128xf32>
    %191 = vector.extract_strided_slice %24 {offsets = [40, 0], sizes = [8, 128], strides = [1, 1]} : vector<64x128xf32> to vector<8x128xf32>
    %192 = arith.addf %190, %191 : vector<8x128xf32>
    %193 = vector.extract_strided_slice %192 {offsets = [0, 0], sizes = [8, 32], strides = [1, 1]} : vector<8x128xf32> to vector<8x32xf32>
    %194 = arith.negf %193 : vector<8x32xf32>
    %195 = math.exp %194 : vector<8x32xf32>
    %cst_47 = arith.constant 1.000000e+00 : f32
    %196 = vector.broadcast %cst_47 : f32 to vector<8x32xf32>
    %197 = arith.addf %196, %195 : vector<8x32xf32>
    %198 = arith.divf %196, %197 : vector<8x32xf32>
    %199 = vector.extract_strided_slice %192 {offsets = [0, 32], sizes = [8, 32], strides = [1, 1]} : vector<8x128xf32> to vector<8x32xf32>
    %200 = arith.negf %199 : vector<8x32xf32>
    %201 = math.exp %200 : vector<8x32xf32>
    %cst_48 = arith.constant 1.000000e+00 : f32
    %202 = vector.broadcast %cst_48 : f32 to vector<8x32xf32>
    %203 = arith.addf %202, %201 : vector<8x32xf32>
    %204 = arith.divf %202, %203 : vector<8x32xf32>
    %205 = vector.extract_strided_slice %192 {offsets = [0, 64], sizes = [8, 32], strides = [1, 1]} : vector<8x128xf32> to vector<8x32xf32>
    %206 = math.tanh %205 : vector<8x32xf32>
    %207 = vector.extract_strided_slice %192 {offsets = [0, 96], sizes = [8, 32], strides = [1, 1]} : vector<8x128xf32> to vector<8x32xf32>
    %208 = arith.negf %207 : vector<8x32xf32>
    %209 = math.exp %208 : vector<8x32xf32>
    %cst_49 = arith.constant 1.000000e+00 : f32
    %210 = vector.broadcast %cst_49 : f32 to vector<8x32xf32>
    %211 = arith.addf %210, %209 : vector<8x32xf32>
    %212 = arith.divf %210, %211 : vector<8x32xf32>
    %213 = arith.mulf %204, %187 : vector<8x32xf32>
    %214 = arith.mulf %198, %206 : vector<8x32xf32>
    %215 = arith.addf %213, %214 : vector<8x32xf32>
    %216 = math.tanh %215 : vector<8x32xf32>
    %217 = arith.mulf %212, %216 : vector<8x32xf32>
    %218 = vector.extract_strided_slice %15 {offsets = [40, 0], sizes = [8, 32], strides = [1, 1]} : vector<64x32xi1> to vector<8x32xi1>
    %219 = arith.select %218, %217, %186 : vector<8x32xi1>, vector<8x32xf32>
    %220 = arith.select %218, %215, %187 : vector<8x32xi1>, vector<8x32xf32>
    %cst_50 = arith.constant 0.000000e+00 : f32
    %221 = vector.broadcast %cst_50 : f32 to vector<8x32xf32>
    %222 = arith.select %218, %217, %221 : vector<8x32xi1>, vector<8x32xf32>
    %cst_51 = arith.constant dense<0.000000e+00> : vector<8x128xf32>
    %223 = tpu.matmul %219, %1, %cst_51 {dimension_numbers = #tpu.dot_dimension_numbers<[1], [0], [0], [1], [0, 0, 1, 1], [], []>} : vector<8x32xf32>, vector<32x128xf32>, vector<8x128xf32> -> vector<8x128xf32>
    %224 = vector.extract_strided_slice %24 {offsets = [48, 0], sizes = [8, 128], strides = [1, 1]} : vector<64x128xf32> to vector<8x128xf32>
    %225 = arith.addf %223, %224 : vector<8x128xf32>
    %226 = vector.extract_strided_slice %225 {offsets = [0, 0], sizes = [8, 32], strides = [1, 1]} : vector<8x128xf32> to vector<8x32xf32>
    %227 = arith.negf %226 : vector<8x32xf32>
    %228 = math.exp %227 : vector<8x32xf32>
    %cst_52 = arith.constant 1.000000e+00 : f32
    %229 = vector.broadcast %cst_52 : f32 to vector<8x32xf32>
    %230 = arith.addf %229, %228 : vector<8x32xf32>
    %231 = arith.divf %229, %230 : vector<8x32xf32>
    %232 = vector.extract_strided_slice %225 {offsets = [0, 32], sizes = [8, 32], strides = [1, 1]} : vector<8x128xf32> to vector<8x32xf32>
    %233 = arith.negf %232 : vector<8x32xf32>
    %234 = math.exp %233 : vector<8x32xf32>
    %cst_53 = arith.constant 1.000000e+00 : f32
    %235 = vector.broadcast %cst_53 : f32 to vector<8x32xf32>
    %236 = arith.addf %235, %234 : vector<8x32xf32>
    %237 = arith.divf %235, %236 : vector<8x32xf32>
    %238 = vector.extract_strided_slice %225 {offsets = [0, 64], sizes = [8, 32], strides = [1, 1]} : vector<8x128xf32> to vector<8x32xf32>
    %239 = math.tanh %238 : vector<8x32xf32>
    %240 = vector.extract_strided_slice %225 {offsets = [0, 96], sizes = [8, 32], strides = [1, 1]} : vector<8x128xf32> to vector<8x32xf32>
    %241 = arith.negf %240 : vector<8x32xf32>
    %242 = math.exp %241 : vector<8x32xf32>
    %cst_54 = arith.constant 1.000000e+00 : f32
    %243 = vector.broadcast %cst_54 : f32 to vector<8x32xf32>
    %244 = arith.addf %243, %242 : vector<8x32xf32>
    %245 = arith.divf %243, %244 : vector<8x32xf32>
    %246 = arith.mulf %237, %220 : vector<8x32xf32>
    %247 = arith.mulf %231, %239 : vector<8x32xf32>
    %248 = arith.addf %246, %247 : vector<8x32xf32>
    %249 = math.tanh %248 : vector<8x32xf32>
    %250 = arith.mulf %245, %249 : vector<8x32xf32>
    %251 = vector.extract_strided_slice %15 {offsets = [48, 0], sizes = [8, 32], strides = [1, 1]} : vector<64x32xi1> to vector<8x32xi1>
    %252 = arith.select %251, %250, %219 : vector<8x32xi1>, vector<8x32xf32>
    %253 = arith.select %251, %248, %220 : vector<8x32xi1>, vector<8x32xf32>
    %cst_55 = arith.constant 0.000000e+00 : f32
    %254 = vector.broadcast %cst_55 : f32 to vector<8x32xf32>
    %255 = arith.select %251, %250, %254 : vector<8x32xi1>, vector<8x32xf32>
    %cst_56 = arith.constant dense<0.000000e+00> : vector<8x128xf32>
    %256 = tpu.matmul %252, %1, %cst_56 {dimension_numbers = #tpu.dot_dimension_numbers<[1], [0], [0], [1], [0, 0, 1, 1], [], []>} : vector<8x32xf32>, vector<32x128xf32>, vector<8x128xf32> -> vector<8x128xf32>
    %257 = vector.extract_strided_slice %24 {offsets = [56, 0], sizes = [8, 128], strides = [1, 1]} : vector<64x128xf32> to vector<8x128xf32>
    %258 = arith.addf %256, %257 : vector<8x128xf32>
    %259 = vector.extract_strided_slice %258 {offsets = [0, 0], sizes = [8, 32], strides = [1, 1]} : vector<8x128xf32> to vector<8x32xf32>
    %260 = arith.negf %259 : vector<8x32xf32>
    %261 = math.exp %260 : vector<8x32xf32>
    %cst_57 = arith.constant 1.000000e+00 : f32
    %262 = vector.broadcast %cst_57 : f32 to vector<8x32xf32>
    %263 = arith.addf %262, %261 : vector<8x32xf32>
    %264 = arith.divf %262, %263 : vector<8x32xf32>
    %265 = vector.extract_strided_slice %258 {offsets = [0, 32], sizes = [8, 32], strides = [1, 1]} : vector<8x128xf32> to vector<8x32xf32>
    %266 = arith.negf %265 : vector<8x32xf32>
    %267 = math.exp %266 : vector<8x32xf32>
    %cst_58 = arith.constant 1.000000e+00 : f32
    %268 = vector.broadcast %cst_58 : f32 to vector<8x32xf32>
    %269 = arith.addf %268, %267 : vector<8x32xf32>
    %270 = arith.divf %268, %269 : vector<8x32xf32>
    %271 = vector.extract_strided_slice %258 {offsets = [0, 64], sizes = [8, 32], strides = [1, 1]} : vector<8x128xf32> to vector<8x32xf32>
    %272 = math.tanh %271 : vector<8x32xf32>
    %273 = vector.extract_strided_slice %258 {offsets = [0, 96], sizes = [8, 32], strides = [1, 1]} : vector<8x128xf32> to vector<8x32xf32>
    %274 = arith.negf %273 : vector<8x32xf32>
    %275 = math.exp %274 : vector<8x32xf32>
    %cst_59 = arith.constant 1.000000e+00 : f32
    %276 = vector.broadcast %cst_59 : f32 to vector<8x32xf32>
    %277 = arith.addf %276, %275 : vector<8x32xf32>
    %278 = arith.divf %276, %277 : vector<8x32xf32>
    %279 = arith.mulf %270, %253 : vector<8x32xf32>
    %280 = arith.mulf %264, %272 : vector<8x32xf32>
    %281 = arith.addf %279, %280 : vector<8x32xf32>
    %282 = math.tanh %281 : vector<8x32xf32>
    %283 = arith.mulf %278, %282 : vector<8x32xf32>
    %284 = vector.extract_strided_slice %15 {offsets = [56, 0], sizes = [8, 32], strides = [1, 1]} : vector<64x32xi1> to vector<8x32xi1>
    %cst_60 = arith.constant 0.000000e+00 : f32
    %285 = vector.broadcast %cst_60 : f32 to vector<8x32xf32>
    %286 = arith.select %284, %283, %285 : vector<8x32xi1>, vector<8x32xf32>
    %287 = tpu.concatenate %57, %90, %123, %156, %189, %222, %255, %286 in 1 : vector<8x32xf32>, vector<8x32xf32>, vector<8x32xf32>, vector<8x32xf32>, vector<8x32xf32>, vector<8x32xf32>, vector<8x32xf32>, vector<8x32xf32> -> vector<8x256xf32>
    %c0_61 = arith.constant 0 : index
    %c0_62 = arith.constant 0 : index
    %c0_63 = arith.constant 0 : index
    %288 = vector.load %arg8[%c0_61, %c0_62, %c0_63] : memref<1x8x256xf32, #tpu.memory_space<vmem>>, vector<1x8x256xf32>
    %289 = vector.shape_cast %288 : vector<1x8x256xf32> to vector<8x256xf32>
    %290 = vector.shape_cast %287 : vector<8x256xf32> to vector<1x8x256xf32>
    tpu.vector_store %arg8[%c0_61, %c0_62, %c0_63], %290 {strides = array<i32>} : memref<1x8x256xf32, #tpu.memory_space<vmem>>, vector<1x8x256xf32>,
    return
  }
  func.func @transform_0(%arg0: i32) -> (i32, i32, i32) {
    %c0_i32 = arith.constant 0 : i32
    %c0_i32_0 = arith.constant 0 : i32
    %c0_i32_1 = arith.constant 0 : i32
    return %arg0, %c0_i32, %c0_i32_0 : i32, i32, i32
  }
  func.func @transform_1(%arg0: i32) -> (i32, i32, i32) {
    %c0_i32 = arith.constant 0 : i32
    %c0_i32_0 = arith.constant 0 : i32
    %c0_i32_1 = arith.constant 0 : i32
    return %arg0, %c0_i32, %c0_i32_0 : i32, i32, i32
  }
  func.func @transform_2(%arg0: i32) -> (i32, i32, i32) {
    %c0_i32 = arith.constant 0 : i32
    %c0_i32_0 = arith.constant 0 : i32
    %c0_i32_1 = arith.constant 0 : i32
    return %arg0, %c0_i32, %c0_i32_0 : i32, i32, i32
  }
  func.func @transform_3(%arg0: i32) -> (i32, i32, i32) {
    %c0_i32 = arith.constant 0 : i32
    %c0_i32_0 = arith.constant 0 : i32
    %c0_i32_1 = arith.constant 0 : i32
    return %arg0, %c0_i32, %c0_i32_0 : i32, i32, i32
  }
  func.func @transform_4(%arg0: i32) -> (i32, i32, i32) {
    %c0_i32 = arith.constant 0 : i32
    %c0_i32_0 = arith.constant 0 : i32
    %c0_i32_1 = arith.constant 0 : i32
    return %arg0, %c0_i32, %c0_i32_0 : i32, i32, i32
  }
  func.func @transform_5(%arg0: i32) -> (i32, i32, i32) {
    %c0_i32 = arith.constant 0 : i32
    %c0_i32_0 = arith.constant 0 : i32
    %c0_i32_1 = arith.constant 0 : i32
    return %arg0, %c0_i32, %c0_i32_0 : i32, i32, i32
  }
  func.func @transform_6(%arg0: i32) -> (i32, i32, i32) {
    %c0_i32 = arith.constant 0 : i32
    %c0_i32_0 = arith.constant 0 : i32
    %c0_i32_1 = arith.constant 0 : i32
    return %arg0, %c0_i32, %c0_i32_0 : i32, i32, i32
  }
  func.func @transform_7(%arg0: i32) -> (i32, i32, i32) {
    %c0_i32 = arith.constant 0 : i32
    %c0_i32_0 = arith.constant 0 : i32
    %c0_i32_1 = arith.constant 0 : i32
    return %arg0, %c0_i32, %c0_i32_0 : i32, i32, i32
  }
}

</mosaic_0001>

<bundles_post_ra>
// kernel: tpu_custom_call.1
= control target key start
LH: loop header
LB: loop body
LE: loop exit
PB: predicated region body
PF: predicated region fallthrough
CT: control target
= control target key end

     0   :  { %12 = vsyncpa [#allocation3], 0  ;;  %s1843_s0 = inlined_call_operand.vmem [shape: f32[2,64,16], index: 0, kind: input, shape index: {}]   ;;  %s1844_s1 = inlined_call_operand.vmem [shape: f32[2,64,1], index: 1, kind: input, shape index: {}]   ;;  %s1845_s2 = inlined_call_operand.vmem [shape: f32[2,16,128], index: 2, kind: input, shape index: {}]   ;;  %s1846_s3 = inlined_call_operand.vmem [shape: f32[2,32,128], index: 3, kind: input, shape index: {}]   ;;  %s1847_s4 = inlined_call_operand.vmem [shape: f32[2,1,128], index: 4, kind: input, shape index: {}]   ;;  %s1848_s5 = inlined_call_operand.vmem [shape: f32[2,1,32], index: 5, kind: input, shape index: {}]   ;;  %s1849_s6 = inlined_call_operand.vmem [shape: f32[2,1,32], index: 6, kind: input, shape index: {}]   ;;  %s1850_s7 = inlined_call_operand.hbm [shape: f32[2,8,256], index: 7, kind: output, shape index: {}]  }
   0x1   :  { %14 = vsyncpa [#allocation3 + $0x1], 0  ;;  %s1490_s24 = smov 0   ;;  %s1492_s25 = smov 0  }
   0x2   :  { %s1494_s26 = smov 0   ;;  %s1496_s27 = smov 0  }
   0x3 LB: > { %s1511_s28 = sadd.s32 4294967295, %s1444_s27   ;;  %s1220_s29 = sadd.s32 4294967294, %s1444_s27   ;;  %s1444_s27 = sphi %s1496_s27, %s1856_s27   ;;  %s1440_s26 = sphi %s1494_s26, %s1855_s26   ;;  %s1436_s25 = sphi %s1492_s25, %s1854_s25   ;;  %s1432_s24 = sphi %s1490_s24, %s1853_s24  }
   0x4   : > { %s1515_s30 = sadd.s32 1, %s1444_s27   ;;  %s209_s8 = sadd.s32 1, %s1440_s26 }
   0x5   : > { %s206_s9 = ssub.s32 %s1444_s27, %s1515_s30  ;;  %p219_p0 = scmp.ne.s32.totalorder %s1440_s26, %s1436_s25 }
   0x6   : > { %p207_p1 = scmp.eq.s32.totalorder %s206_s9, 0  ;;  %p220_p2 = scmp.eq.s32.totalorder %s1511_s28, 1 }
   0x7   : > { %p225_p3 = scmp.ne.s32.totalorder %s1436_s25, %s1432_s24  ;;  %p226_p4 = scmp.eq.s32.totalorder %s1220_s29, 1 }
   0x8   : > { %s1526_s10 = scalar_select %p207_p1, %s1440_s26, %s209_s8  }
   0x9   : > { %p1528_p5 = por %p220_p2, %p219_p0  ;;  %p1532_p6 = por %p226_p4, %p225_p3 }
   0xa   : > { %p1223_p7 = scmp.ge.s32.totalorder %s1444_s27, 1  ;;  %p294_p8 = scmp.lt.s32.totalorder %s1444_s27, 3 }
   0xc   : > { %p295_p9 = pnand %p1223_p7, %p294_p8 }
   0xd   : > { %p350_p10 = scmp.lt.s32.totalorder (!%p295_p9), %s1511_s28, 1  ;;  %s1446_s9 = smov (!%p295_p9), 64  }
   0xe   : > { %298 = sbr.rel (%p295_p9) target bundleno = 4588 (0x11ec), region = 48 }
  0x13   : > { %s1540_s13 = scalar_select %p350_p10, %s1511_s28, 1  ;;  %vm459_vm0 = vcmask 130048   ;;  %vm525_vm1 = vcmask 261120   ;;  %v1448_v20 = vmov 0  }
  0x14   : > { %1312 = vset.pattern.permute.xlu2 %v1448_v20  ;;  %1313 = vset.pattern.permute.xlu1 %v1448_v20 }
  0x15   : > { %s1265_s14 = sshll.u32 %s1540_s13, 5  ;;  %s1264_s15 = sshll.u32 %s1540_s13, 4  ;;  %1314 = vset.pattern.permute.xlu0 %v1448_v20 }
  0x16   : > { %s369_s18 = scalar_lea.vmem %s1846_s3, %s1265_s14  ;;  %s364_s21 = scalar_lea.vmem %s1845_s2, %s1264_s15 }
  0x17   : > { %v1550_v0 = vld [vmem:[%s369_s18 + $0x18] sm:$0xff]  ;;  %v454_v1 = vld [vmem:[%s364_s21 + $0x8] sm:$0xff]  ;;  %v1552_v2 = vld [vmem:[%s369_s18 + $0x10] sm:$0xff]  ;;  %s1262_s22 = sshll.u32 %s1540_s13, 6  ;;  %s375_s15 = scalar_lea.vmem %s1848_s5, %s1540_s13 }
  0x18   : > { %540 = vmatpush.msra.mxu1 %v1550_v0  ;;  %498 = vmatpush.msra.mxu0 %v454_v1  ;;  %v453_v3 = vld [vmem:[%s364_s21] sm:$0xff]  ;;  %s1561_s8 = scalar_lea.vmem %s1843_s0, %s1262_s22  ;;  %v1567_v4 = vld [vmem:[%s369_s18 + $0x8] sm:$0xff]  ;;  %s372_s19 = scalar_lea.vmem %s1847_s4, %s1540_s13 }
  0x19   : > { %v445_v5 = vld [vmem:[%s1561_s8] sm:$0xff]  ;;  %611 = vmatpush.msra.mxu2 %v1550_v0  ;;  %1267 = vmatpush.msra.mxu3 %v454_v1  ;;  %s378_s21 = scalar_lea.vmem %s1849_s6, %s1540_s13  ;;  %s1447_s14 = smov 32   ;;  %v446_v42 = vld [vmem:[%s1561_s8 + $0x8] sm:$0xff] }
  0x1a   : > { %541 = vmatpush.msra.mxu1 %v1552_v2  ;;  %499 = vmatpush.msra.mxu0 %v453_v3  ;;  %v1577_v6 = vld [vmem:[%s369_s18] sm:$0xff]  ;;  %s1623_s17 = scalar_lea.vmem %s1844_s1, %s1262_s22  ;;  %s1449_s13 = smov 96  }
  0x1b   : > { %1233 = vmatmul.msk.f32.vlgmr.msra.gmra.mxu0 %vm459_vm0, %v445_v5  ;;  %v1579_v7 = vld [vmem:[%s375_s15] ss:$0 sm:$0xff]  ;;  %612 = vmatpush.msra.mxu2 %v1552_v2  ;;  %v390_v49 = vld [vmem:[%s1623_s17 + $0x8] sm:$0xff]  ;;  %s347_s22 = sand.u32 1, %s1436_s25  }
  0x1c   : > { %542 = vmatpush.msra.mxu1 %v1567_v4  ;;  %1268 = vmatpush.msra.mxu3 %v453_v3  ;;  %v1613_v8 = vld [vmem:[%s372_s19] ss:$0 sm:$0xff]  ;;  %s1266_s19 = sshll.u32 %s1511_s28, 4  ;;  %s1082_s28 = scalar_lea.sflag [#allocation3], %s347_s22 }
  0x1d   : > { %613 = vmatpush.msra.mxu2 %v1567_v4  ;;  %v1317_v14 = vld [vmem:[%s378_s21] ss:$0 sm:$0xff]  ;;  %s1093_s21 = scalar_lea.hbm %s1850_s7, %s1266_s19 }
  0x1e   : > { %676 = vmatpush.msrb.mxu3 %v1550_v0  ;;  %543 = vmatpush.msra.mxu1 %v1577_v6  ;;  %v389_v18 = vld [vmem:[%s1623_s17] sm:$0xff] }
  0x1f   : > { %1241 = vmatmul.msk.f32.vlgmr.msra.gmra.mxu1 %vm525_vm1, %v1579_v7  ;;  %614 = vmatpush.msra.mxu2 %v1577_v6 }
  0x20   : > { %677 = vmatpush.msrb.mxu3 %v1552_v2  ;;  %741 = vmatpush.msrb.mxu1 %v1550_v0 }
  0x21   : > { %806 = vmatpush.msrb.mxu2 %v1550_v0  ;;  %399 = vperm.xlu2 %1312, %v389_v18  }
  0x22   : > { %678 = vmatpush.msrb.mxu3 %v1567_v4  ;;  %742 = vmatpush.msrb.mxu1 %v1552_v2 }
  0x23   : > { %807 = vmatpush.msrb.mxu2 %v1552_v2  ;;  %1234 = vmatmul.msk.f32.gmra.mxu0 %vm459_vm0, %v446_v42 }
  0x24   : > { %679 = vmatpush.msrb.mxu3 %v1577_v6  ;;  %743 = vmatpush.msrb.mxu1 %v1567_v4 }
  0x25   : > { %808 = vmatpush.msrb.mxu2 %v1567_v4 }
  0x26   : > { %744 = vmatpush.msrb.mxu1 %v1577_v6 }
  0x27   : > { %809 = vmatpush.msrb.mxu2 %v1577_v6 }
  0x28   : > { %936 = vmatpush.msra.mxu1 %v1550_v0 }
  0x29   : > { %588 = vrot.lane.b32.xlu2 %v1579_v7, %s1449_s13 }
  0x2a   : > { %937 = vmatpush.msra.mxu1 %v1552_v2 }
  0x2c   : > { %938 = vmatpush.msra.mxu1 %v1567_v4 }
  0x2e   : > { %939 = vmatpush.msra.mxu1 %v1577_v6 }
  0x7b   : > { %v1630_v37 = vpop.permute.xlu2 %399 }
  0x7c   : > { %vm437_vm6 = vcmp.ne.f32.partialorder %v1630_v37, 0.0 }
  0x83   : > { %v589_v39 = vpop.permute.xlu2 %588 }
  0x98   : > { %v501_v9 = vpop.f32.mrf.mxu0 }
  0x99   : > { %v502_v10 = vadd.f32 %v1613_v8, %v501_v9 }
  0x9c   : > { %v545_v11 = vpop.f32.mrf.mxu1 }
  0x9d   : > { %v546_v12 = vadd.f32 %v545_v11, %v502_v10  ;;  %v450_v11 = vld [vmem:[%s1561_s8 + $0x28] sm:$0xff] }
  0x9e   : > { %1238 = vmatmul.msk.f32.vlgmr.msra.gmra.mxu3 %vm459_vm0, %v450_v11 }
  0x9f   : > { %1318 = vtanh.f32 %v546_v12  ;;  %v1242_v15 = vmul.f32 -1.442695, %v546_v12  ;;  %871 = vmatpush.msra.mxu3 %v1550_v0  ;;  %v451_v12 = vld [vmem:[%s1561_s8 + $0x30] sm:$0xff] }
  0xa0   : > { %v504_v44 = vpop.f32.mrf.mxu0 }
  0xa1   : > { %1320 = vpow2.f32 %v1242_v15  ;;  %v505_v45 = vadd.f32 %v1613_v8, %v504_v44  ;;  %872 = vmatpush.msra.mxu3 %v1552_v2 }
  0xa3   : > { %873 = vmatpush.msra.mxu3 %v1567_v4 }
  0xa5   : > { %v1319_v13 = vpop.eup %1318  ;;  %874 = vmatpush.msra.mxu3 %v1577_v6 }
  0xa6   : > { %573 = vrot.lane.b32.xlu0 %v1319_v13, %s1446_s9  ;;  %1239 = vmatmul.msk.f32.gmra.mxu3 %vm459_vm0, %v451_v12  ;;  %v452_v13 = vld [vmem:[%s1561_s8 + $0x38] sm:$0xff] }
  0xa7   : > { %v1321_v16 = vpop.eup %1320 }
  0xa8   : > { %v551_v17 = vadd.f32 1.0, %v1321_v16 }
  0xaa   : > { %1322 = vrcp.f32 %v551_v17  ;;  %v563_v25 = vand.u32 2147483648, %v551_v17  ;;  %vm557_vm3 = vweird.f32 %v551_v17  ;;  %v561_v26 = vand.u32 2147483647, %v551_v17 }
  0xac   : > { %v564_v28 = vor.u32 1.1754944e-38, %v563_v25  ;;  %vm562_vm5 = vcmp.eq.f32.partialorder %v561_v26, 8.507059e+37 }
  0xae   : > { %568 = vrot.lane.b32.xlu0 %v1317_v14, %s1447_s14  ;;  %1240 = vmatmul.msk.f32.gmra.mxu3 %vm459_vm0, %v452_v13 }
  0xb0   : > { %v1323_v19 = vpop.eup %1322 }
  0xb1   : > { %v553_v21 = vmul.f32 %v1323_v19, %v551_v17  ;;  %vm558_vm2 = vweird.f32 %v1323_v19 }
  0xb2   : > { %vm559_vm4 = vmor %vm557_vm3, %vm558_vm2 }
  0xb3   : > { %v554_v22 = vsub.f32 1.0, %v553_v21 }
  0xb5   : > { %v555_v23 = vmul.f32 %v1323_v19, %v554_v22 }
  0xb7   : > { %v556_v24 = vadd.f32 %v1323_v19, %v555_v23 }
  0xb9   : > { %v560_v27 = vsel %vm559_vm4, %v1323_v19, %v556_v24 }
  0xba   : > { %v565_v30 = vsel %vm562_vm5, %v564_v28, %v560_v27  ;;  %v391_v27 = vld [vmem:[%s1623_s17 + $0x10] sm:$0xff]  ;;  %v392_v28 = vld [vmem:[%s1623_s17 + $0x18] sm:$0xff] }
 0x118   : > { %v574_v29 = vpop.permute.xlu0 %573 }
 0x119   : > { %v576_v31 = vmul.f32 %v574_v29, %v565_v30 }
 0x11b   : > { %578 = vrot.lane.b32.xlu1 %v576_v31, %s1447_s14 }
 0x120   : > { %v569_v32 = vpop.permute.xlu0 %568 }
 0x121   : > { %v571_v33 = vmul.f32 %v569_v32, %v565_v30 }
 0x18d   : > { %v579_v34 = vpop.permute.xlu1 %578 }
 0x18e   : > { %v581_v35 = vadd.f32 %v579_v34, %v571_v33 }
 0x190   : > { %1324 = vtanh.f32 %v581_v35  ;;  %v1655_v3 = vsel %vm437_vm6, %v581_v35, %v569_v32 }
 0x196   : > { %v1325_v36 = vpop.eup %1324 }
 0x197   : > { %584 = vrot.lane.b32.xlu1 %v1325_v36, %s1446_s9 }
 0x209   : > { %v585_v38 = vpop.permute.xlu1 %584 }
 0x20a   : > { %v1632_v40 = vmul.f32 %v585_v38, %v565_v30 }
 0x20c   : > { %v1638_v41 = vsel %vm437_vm6, %v1632_v40, %v589_v39 }
 0x20d   : > { %595 = vrot.lane.b32.xlu0 %v1638_v41, %s1447_s14 }
 0x27f   : > { %v596_v43 = vpop.permute.xlu0 %595 }
 0x280   : > { %1243 = vmatmul.msk.f32.vlgmr.msra.gmra.mxu2 %vm525_vm1, %v596_v43 }
 0x281   : > { %1001 = vmatpush.msra.mxu2 %v1550_v0 }
 0x283   : > { %1002 = vmatpush.msra.mxu2 %v1552_v2  ;;  %v447_v2 = vld [vmem:[%s1561_s8 + $0x10] sm:$0xff] }
 0x284   : > { %1235 = vmatmul.msk.f32.gmra.mxu0 %vm459_vm0, %v447_v2 }
 0x285   : > { %1003 = vmatpush.msra.mxu2 %v1567_v4 }
 0x287   : > { %1004 = vmatpush.msra.mxu2 %v1577_v6  ;;  %v1682_v6 = vpop.f32.mrf.mxu3 }
 0x28f   : > { %v1684_v17 = vpop.f32.mrf.mxu3 }
 0x297   : > { %v1686_v18 = vpop.f32.mrf.mxu3 }
 0x301   : > { %v507_v19 = vpop.f32.mrf.mxu0 }
 0x302   : > { %v508_v20 = vadd.f32 %v1613_v8, %v507_v19 }
 0x303   : > { %v616_v46 = vpop.f32.mrf.mxu2 }
 0x304   : > { %v617_v47 = vadd.f32 %v616_v46, %v505_v45 }
 0x306   : > { %1326 = vtanh.f32 %v617_v47  ;;  %v1244_v50 = vmul.f32 -1.442695, %v617_v47 }
 0x308   : > { %1328 = vpow2.f32 %v1244_v50 }
 0x30c   : > { %v1327_v48 = vpop.eup %1326 }
 0x30d   : > { %641 = vrot.lane.b32.xlu1 %v1327_v48, %s1446_s9  ;;  %v448_v48 = vld [vmem:[%s1561_s8 + $0x18] sm:$0xff] }
 0x30e   : > { %v1329_v51 = vpop.eup %1328  ;;  %1236 = vmatmul.msk.f32.gmra.mxu0 %vm459_vm0, %v448_v48 }
 0x30f   : > { %v622_v52 = vadd.f32 1.0, %v1329_v51 }
 0x311   : > { %1330 = vrcp.f32 %v622_v52  ;;  %v634_v58 = vand.u32 2147483648, %v622_v52  ;;  %vm628_vm8 = vweird.f32 %v622_v52  ;;  %v632_v59 = vand.u32 2147483647, %v622_v52 }
 0x313   : > { %v635_v61 = vor.u32 1.1754944e-38, %v634_v58  ;;  %vm633_vm10 = vcmp.eq.f32.partialorder %v632_v59, 8.507059e+37 }
 0x315   : > { %404 = vperm.xlu1 %1313, %v390_v49  }
 0x317   : > { %v1331_v53 = vpop.eup %1330 }
 0x318   : > { %v624_v54 = vmul.f32 %v1331_v53, %v622_v52  ;;  %vm629_vm7 = vweird.f32 %v1331_v53 }
 0x319   : > { %vm630_vm9 = vmor %vm628_vm8, %vm629_vm7 }
 0x31a   : > { %v625_v55 = vsub.f32 1.0, %v624_v54 }
 0x31c   : > { %v626_v56 = vmul.f32 %v1331_v53, %v625_v55 }
 0x31e   : > { %v627_v57 = vadd.f32 %v1331_v53, %v626_v56 }
 0x320   : > { %v631_v60 = vsel %vm630_vm9, %v1331_v53, %v627_v57 }
 0x321   : > { %v636_v63 = vsel %vm633_vm10, %v635_v61, %v631_v60 }
 0x322   : > { %v639_v5 = vmul.f32 %v636_v63, %v1655_v3 }
 0x37f   : > { %v642_v62 = vpop.permute.xlu1 %641 }
 0x380   : > { %v644_v1 = vmul.f32 %v642_v62, %v636_v63 }
 0x382   : > { %646 = vrot.lane.b32.xlu2 %v644_v1, %s1447_s14 }
 0x387   : > { %v1669_v14 = vpop.permute.xlu1 %404 }
 0x388   : > { %vm438_vm11 = vcmp.ne.f32.partialorder %v1669_v14, 0.0 }
 0x38b   : > { %v510_v54 = vpop.f32.mrf.mxu0 }
 0x38c   : > { %v511_v55 = vadd.f32 %v1613_v8, %v510_v54 }
 0x3dc   : > { %v647_v7 = vpop.permute.xlu2 %646 }
 0x3dd   : > { %v649_v9 = vadd.f32 %v647_v7, %v639_v5 }
 0x3df   : > { %1332 = vtanh.f32 %v649_v9  ;;  %v657_v43 = vsel %vm438_vm11, %v649_v9, %v1655_v3 }
 0x3e5   : > { %v1333_v10 = vpop.eup %1332 }
 0x3e6   : > { %652 = vrot.lane.b32.xlu0 %v1333_v10, %s1446_s9 }
 0x458   : > { %v653_v15 = vpop.permute.xlu0 %652 }
 0x459   : > { %v1671_v16 = vmul.f32 %v653_v15, %v636_v63 }
 0x45b   : > { %v656_v0 = vsel %vm438_vm11, %v1671_v16, %v1638_v41 }
 0x45c   : > { %660 = vrot.lane.b32.xlu2 %v656_v0, %s1447_s14 }
 0x4b6   : > { %v661_v4 = vpop.permute.xlu2 %660 }
 0x4b7   : > { %1245 = vmatmul.msk.f32.vlgmr.msrb.gmra.mxu3 %vm525_vm1, %v661_v4 }
 0x53a   : > { %v681_v21 = vpop.f32.mrf.mxu3 }
 0x53b   : > { %v682_v22 = vadd.f32 %v681_v21, %v508_v20 }
 0x53d   : > { %1334 = vtanh.f32 %v682_v22  ;;  %v1246_v24 = vmul.f32 -1.442695, %v682_v22 }
 0x53f   : > { %1336 = vpow2.f32 %v1246_v24 }
 0x543   : > { %v1335_v23 = vpop.eup %1334 }
 0x544   : > { %706 = vrot.lane.b32.xlu0 %v1335_v23, %s1446_s9 }
 0x545   : > { %v1337_v25 = vpop.eup %1336 }
 0x546   : > { %v687_v26 = vadd.f32 1.0, %v1337_v25  ;;  %v449_v25 = vld [vmem:[%s1561_s8 + $0x20] sm:$0xff]  ;;  %s1224_s8 = sshll.u32 %s347_s22, 4 }
 0x547   : > { %1237 = vmatmul.msk.f32.gmra.mxu0 %vm459_vm0, %v449_v25  ;;  %s349_s23 = scalar_lea.vmem [#allocation2], %s1224_s8 }
 0x548   : > { %1338 = vrcp.f32 %v687_v26  ;;  %v699_v34 = vand.u32 2147483648, %v687_v26  ;;  %vm693_vm13 = vweird.f32 %v687_v26  ;;  %v697_v35 = vand.u32 2147483647, %v687_v26  ;;  %s1095_s29 = sshll.u32 %s349_s23, 4  ;;  %s1096_s29 = int_to_ptr.vmem [resolvable:$true] %s1095_s29 }
 0x54a   : > { %v700_v38 = vor.u32 1.1754944e-38, %v699_v34  ;;  %vm698_vm15 = vcmp.eq.f32.partialorder %v697_v35, 8.507059e+37 }
 0x54c   : > { %409 = vperm.xlu0 %1314, %v391_v27  }
 0x54e   : > { %v1339_v29 = vpop.eup %1338 }
 0x54f   : > { %v689_v30 = vmul.f32 %v1339_v29, %v687_v26  ;;  %vm694_vm12 = vweird.f32 %v1339_v29 }
 0x550   : > { %vm695_vm14 = vmor %vm693_vm13, %vm694_vm12 }
 0x551   : > { %v690_v31 = vsub.f32 1.0, %v689_v30 }
 0x553   : > { %v691_v32 = vmul.f32 %v1339_v29, %v690_v31 }
 0x554   : > { %414 = vperm.xlu0 %1314, %v392_v28  }
 0x555   : > { %v692_v33 = vadd.f32 %v1339_v29, %v691_v32  ;;  %v393_v32 = vld [vmem:[%s1623_s17 + $0x20] sm:$0xff] }
 0x557   : > { %v696_v36 = vsel %vm695_vm14, %v1339_v29, %v692_v33 }
 0x558   : > { %v701_v41 = vsel %vm698_vm15, %v700_v38, %v696_v36 }
 0x559   : > { %v704_v44 = vmul.f32 %v701_v41, %v657_v43 }
 0x5b6   : > { %v707_v39 = vpop.permute.xlu0 %706 }
 0x5b7   : > { %v709_v42 = vmul.f32 %v707_v39, %v701_v41 }
 0x5b9   : > { %711 = vrot.lane.b32.xlu1 %v709_v42, %s1447_s14 }
 0x5be   : > { %v1699_v49 = vpop.permute.xlu0 %409 }
 0x5bf   : > { %vm439_vm2 = vcmp.ne.f32.partialorder %v1699_v49, 0.0 }
 0x5c4   : > { %v513_v27 = vpop.f32.mrf.mxu0 }
 0x5c5   : > { %v514_v28 = vadd.f32 %v1613_v8, %v513_v27 }
 0x5c6   : > { %v1715_v21 = vpop.permute.xlu0 %414 }
 0x5c7   : > { %vm440_vm8 = vcmp.ne.f32.partialorder %v1715_v21, 0.0 }
 0x62b   : > { %v712_v45 = vpop.permute.xlu1 %711 }
 0x62c   : > { %v714_v46 = vadd.f32 %v712_v45, %v704_v44 }
 0x62e   : > { %1340 = vtanh.f32 %v714_v46 }
 0x634   : > { %v1341_v47 = vpop.eup %1340 }
 0x635   : > { %717 = vrot.lane.b32.xlu2 %v1341_v47, %s1446_s9 }
 0x68f   : > { %v718_v50 = vpop.permute.xlu2 %717 }
 0x690   : > { %v1701_v51 = vmul.f32 %v718_v50, %v701_v41 }
 0x692   : > { %v721_v52 = vsel %vm439_vm2, %v1701_v51, %v656_v0  ;;  %v722_v0 = vsel %vm439_vm2, %v714_v46, %v657_v43  ;;  %v723_v37 = vsel %vm439_vm2, %v1701_v51, 0.0 }
 0x693   : > { %725 = vrot.lane.b32.xlu1 %v721_v52, %s1447_s14 }
 0x705   : > { %v726_v53 = vpop.permute.xlu1 %725 }
 0x706   : > { %1247 = vmatmul.msk.f32.vlgmr.msrb.gmra.mxu1 %vm525_vm1, %v726_v53 }
 0x783   : > { %v746_v56 = vpop.f32.mrf.mxu1 }
 0x784   : > { %v747_v57 = vadd.f32 %v746_v56, %v511_v55 }
 0x786   : > { %1342 = vtanh.f32 %v747_v57  ;;  %v1248_v59 = vmul.f32 -1.442695, %v747_v57 }
 0x788   : > { %1344 = vpow2.f32 %v1248_v59 }
 0x78c   : > { %v1343_v58 = vpop.eup %1342 }
 0x78d   : > { %771 = vrot.lane.b32.xlu2 %v1343_v58, %s1446_s9 }
 0x78e   : > { %v1345_v60 = vpop.eup %1344 }
 0x78f   : > { %v752_v61 = vadd.f32 1.0, %v1345_v60 }
 0x791   : > { %1346 = vrcp.f32 %v752_v61  ;;  %v764_v7 = vand.u32 2147483648, %v752_v61  ;;  %vm758_vm4 = vweird.f32 %v752_v61  ;;  %v762_v9 = vand.u32 2147483647, %v752_v61 }
 0x793   : > { %v765_v11 = vor.u32 1.1754944e-38, %v764_v7  ;;  %vm763_vm7 = vcmp.eq.f32.partialorder %v762_v9, 8.507059e+37 }
 0x797   : > { %v1347_v62 = vpop.eup %1346 }
 0x798   : > { %v754_v63 = vmul.f32 %v1347_v62, %v752_v61  ;;  %vm759_vm3 = vweird.f32 %v1347_v62 }
 0x799   : > { %vm760_vm5 = vmor %vm758_vm4, %vm759_vm3 }
 0x79a   : > { %v755_v1 = vsub.f32 1.0, %v754_v63 }
 0x79c   : > { %v756_v3 = vmul.f32 %v1347_v62, %v755_v1 }
 0x79e   : > { %v757_v5 = vadd.f32 %v1347_v62, %v756_v3 }
 0x7a0   : > { %v761_v10 = vsel %vm760_vm5, %v1347_v62, %v757_v5  ;;  %v517_v62 = vadd.f32 %v1613_v8, %v1682_v6  ;;  %v394_v5 = vld [vmem:[%s1623_s17 + $0x28] sm:$0xff] }
 0x7a1   : > { %v766_v13 = vsel %vm763_vm7, %v765_v11, %v761_v10 }
 0x7a2   : > { %v769_v2 = vmul.f32 %v766_v13, %v722_v0 }
 0x7e7   : > { %v772_v12 = vpop.permute.xlu2 %771 }
 0x7e8   : > { %v774_v15 = vmul.f32 %v772_v12, %v766_v13 }
 0x7ea   : > { %776 = vrot.lane.b32.xlu1 %v774_v15, %s1447_s14 }
 0x85c   : > { %v777_v4 = vpop.permute.xlu1 %776 }
 0x85d   : > { %v779_v19 = vadd.f32 %v777_v4, %v769_v2 }
 0x85f   : > { %1348 = vtanh.f32 %v779_v19 }
 0x865   : > { %v1349_v20 = vpop.eup %1348 }
 0x866   : > { %782 = vrot.lane.b32.xlu2 %v1349_v20, %s1446_s9 }
 0x8c0   : > { %v783_v22 = vpop.permute.xlu2 %782 }
 0x8c1   : > { %v1717_v23 = vmul.f32 %v783_v22, %v766_v13 }
 0x8c3   : > { %v786_v24 = vsel %vm440_vm8, %v1717_v23, %v721_v52  ;;  %v787_v52 = vsel %vm440_vm8, %v779_v19, %v722_v0 }
 0x8c4   : > { %790 = vrot.lane.b32.xlu1 %v786_v24, %s1447_s14 }
 0x936   : > { %v791_v26 = vpop.permute.xlu1 %790 }
 0x937   : > { %1249 = vmatmul.msk.f32.vlgmr.msrb.gmra.mxu2 %vm525_vm1, %v791_v26 }
 0x9ba   : > { %v811_v29 = vpop.f32.mrf.mxu2 }
 0x9bb   : > { %v812_v30 = vadd.f32 %v811_v29, %v514_v28 }
 0x9bd   : > { %1350 = vtanh.f32 %v812_v30  ;;  %v1250_v33 = vmul.f32 -1.442695, %v812_v30 }
 0x9bf   : > { %1352 = vpow2.f32 %v1250_v33 }
 0x9c3   : > { %v1351_v31 = vpop.eup %1350 }
 0x9c4   : > { %836 = vrot.lane.b32.xlu2 %v1351_v31, %s1446_s9 }
 0x9c5   : > { %v1353_v34 = vpop.eup %1352 }
 0x9c6   : > { %v817_v35 = vadd.f32 1.0, %v1353_v34 }
 0x9c8   : > { %1354 = vrcp.f32 %v817_v35  ;;  %v829_v43 = vand.u32 2147483648, %v817_v35  ;;  %vm823_vm9 = vweird.f32 %v817_v35  ;;  %v827_v44 = vand.u32 2147483647, %v817_v35 }
 0x9ca   : > { %v830_v46 = vor.u32 1.1754944e-38, %v829_v43  ;;  %vm828_vm12 = vcmp.eq.f32.partialorder %v827_v44, 8.507059e+37 }
 0x9cc   : > { %419 = vperm.xlu2 %1312, %v393_v32  }
 0x9ce   : > { %v1355_v36 = vpop.eup %1354 }
 0x9cf   : > { %v819_v38 = vmul.f32 %v1355_v36, %v817_v35  ;;  %vm824_vm0 = vweird.f32 %v1355_v36  ;;  %v520_v35 = vadd.f32 %v1613_v8, %v1684_v17 }
 0x9d0   : > { %vm825_vm10 = vmor %vm823_vm9, %vm824_vm0 }
 0x9d1   : > { %v820_v39 = vsub.f32 1.0, %v819_v38 }
 0x9d3   : > { %v821_v41 = vmul.f32 %v1355_v36, %v820_v39 }
 0x9d5   : > { %v822_v42 = vadd.f32 %v1355_v36, %v821_v41  ;;  %v395_v41 = vld [vmem:[%s1623_s17 + $0x30] sm:$0xff] }
 0x9d7   : > { %v826_v45 = vsel %vm825_vm10, %v1355_v36, %v822_v42 }
 0x9d8   : > { %v831_v48 = vsel %vm828_vm12, %v830_v46, %v826_v45 }
 0x9d9   : > { %v834_v53 = vmul.f32 %v831_v48, %v787_v52 }
 0xa1e   : > { %v837_v47 = vpop.permute.xlu2 %836 }
 0xa1f   : > { %v839_v50 = vmul.f32 %v837_v47, %v831_v48 }
 0xa21   : > { %841 = vrot.lane.b32.xlu0 %v839_v50, %s1447_s14 }
 0xa26   : > { %v1734_v57 = vpop.permute.xlu2 %419 }
 0xa27   : > { %vm441_vm13 = vcmp.ne.f32.partialorder %v1734_v57, 0.0 }
 0xa93   : > { %v842_v54 = vpop.permute.xlu0 %841 }
 0xa94   : > { %v844_v55 = vadd.f32 %v842_v54, %v834_v53 }
 0xa96   : > { %1356 = vtanh.f32 %v844_v55  ;;  %v852_v25 = vsel %vm441_vm13, %v844_v55, %v787_v52 }
 0xa9c   : > { %v1357_v56 = vpop.eup %1356 }
 0xa9d   : > { %847 = vrot.lane.b32.xlu1 %v1357_v56, %s1446_s9 }
 0xb0f   : > { %v848_v58 = vpop.permute.xlu1 %847 }
 0xb10   : > { %v1736_v59 = vmul.f32 %v848_v58, %v831_v48 }
 0xb12   : > { %v851_v60 = vsel %vm441_vm13, %v1736_v59, %v786_v24  ;;  %v853_v14 = vsel %vm441_vm13, %v1736_v59, 0.0 }
 0xb13   : > { %855 = vrot.lane.b32.xlu0 %v851_v60, %s1447_s14 }
 0xb85   : > { %v856_v61 = vpop.permute.xlu0 %855 }
 0xb86   : > { %1251 = vmatmul.msk.f32.vlgmr.msra.gmra.mxu3 %vm525_vm1, %v856_v61 }
 0xc09   : > { %v876_v63 = vpop.f32.mrf.mxu3 }
 0xc0a   : > { %v877_v1 = vadd.f32 %v876_v63, %v517_v62 }
 0xc0c   : > { %1358 = vtanh.f32 %v877_v1  ;;  %v1252_v7 = vmul.f32 -1.442695, %v877_v1 }
 0xc0e   : > { %1360 = vpow2.f32 %v1252_v7 }
 0xc12   : > { %v1359_v3 = vpop.eup %1358 }
 0xc13   : > { %901 = vrot.lane.b32.xlu1 %v1359_v3, %s1446_s9 }
 0xc14   : > { %v1361_v9 = vpop.eup %1360 }
 0xc15   : > { %v882_v10 = vadd.f32 1.0, %v1361_v9 }
 0xc17   : > { %1362 = vrcp.f32 %v882_v10  ;;  %v894_v6 = vand.u32 2147483648, %v882_v10  ;;  %vm888_vm15 = vweird.f32 %v882_v10  ;;  %v892_v2 = vand.u32 2147483647, %v882_v10 }
 0xc19   : > { %v895_v19 = vor.u32 1.1754944e-38, %v894_v6  ;;  %vm893_vm4 = vcmp.eq.f32.partialorder %v892_v2, 8.507059e+37  ;;  %v396_v6 = vld [vmem:[%s1623_s17 + $0x38] sm:$0xff] }
 0xc1b   : > { %424 = vperm.xlu1 %1313, %v394_v5  }
 0xc1d   : > { %v1363_v11 = vpop.eup %1362 }
 0xc1e   : > { %v884_v12 = vmul.f32 %v1363_v11, %v882_v10  ;;  %vm889_vm14 = vweird.f32 %v1363_v11  ;;  %v658_v10 = vsel %vm438_vm11, %v1671_v16, 0.0 }
 0xc1f   : > { %vm890_vm3 = vmor %vm888_vm15, %vm889_vm14 }
 0xc20   : > { %v885_v13 = vsub.f32 1.0, %v884_v12  ;;  %v523_v12 = vadd.f32 %v1613_v8, %v1686_v18 }
 0xc22   : > { %v886_v15 = vmul.f32 %v1363_v11, %v885_v13 }
 0xc24   : > { %v887_v0 = vadd.f32 %v1363_v11, %v886_v15 }
 0xc26   : > { %v891_v4 = vsel %vm890_vm3, %v1363_v11, %v887_v0  ;;  %vm1074_vm3 = vcmask 785408  }
 0xc27   : > { %v896_v22 = vsel %vm893_vm4, %v895_v19, %v891_v4 }
 0xc28   : > { %v899_v26 = vmul.f32 %v896_v22, %v852_v25 }
 0xc85   : > { %v902_v20 = vpop.permute.xlu1 %901 }
 0xc86   : > { %v904_v24 = vmul.f32 %v902_v20, %v896_v22 }
 0xc88   : > { %906 = vrot.lane.b32.xlu2 %v904_v24, %s1447_s14 }
 0xc8d   : > { %v1752_v30 = vpop.permute.xlu1 %424 }
 0xc8e   : > { %vm442_vm5 = vcmp.ne.f32.partialorder %v1752_v30, 0.0 }
 0xce2   : > { %v907_v27 = vpop.permute.xlu2 %906 }
 0xce3   : > { %v909_v28 = vadd.f32 %v907_v27, %v899_v26 }
 0xce5   : > { %1364 = vtanh.f32 %v909_v28 }
 0xceb   : > { %v1365_v29 = vpop.eup %1364 }
 0xcec   : > { %912 = vrot.lane.b32.xlu0 %v1365_v29, %s1446_s9 }
 0xd5e   : > { %v913_v31 = vpop.permute.xlu0 %912 }
 0xd5f   : > { %v1754_v32 = vmul.f32 %v913_v31, %v896_v22  ;;  %v593_v31 = vsel %vm437_vm6, %v1632_v40, 0.0  ;;  %vm1072_vm6 = vcmask 523264  }
 0xd61   : > { %v916_v33 = vsel %vm442_vm5, %v1754_v32, %v851_v60  ;;  %v917_v60 = vsel %vm442_vm5, %v909_v28, %v852_v25 }
 0xd62   : > { %920 = vrot.lane.b32.xlu2 %v916_v33, %s1447_s14 }
 0xdbc   : > { %v921_v34 = vpop.permute.xlu2 %920 }
 0xdbd   : > { %1253 = vmatmul.msk.f32.vlgmr.msra.gmra.mxu1 %vm525_vm1, %v921_v34 }
 0xe3a   : > { %v941_v36 = vpop.f32.mrf.mxu1 }
 0xe3b   : > { %v942_v38 = vadd.f32 %v941_v36, %v520_v35 }
 0xe3d   : > { %1366 = vtanh.f32 %v942_v38  ;;  %v1254_v42 = vmul.f32 -1.442695, %v942_v38 }
 0xe3f   : > { %1368 = vpow2.f32 %v1254_v42 }
 0xe43   : > { %v1367_v39 = vpop.eup %1366 }
 0xe44   : > { %966 = vrot.lane.b32.xlu0 %v1367_v39, %s1446_s9 }
 0xe45   : > { %v1369_v43 = vpop.eup %1368 }
 0xe46   : > { %v947_v44 = vadd.f32 1.0, %v1369_v43 }
 0xe48   : > { %1370 = vrcp.f32 %v947_v44  ;;  %v959_v17 = vand.u32 2147483648, %v947_v44  ;;  %vm953_vm0 = vweird.f32 %v947_v44  ;;  %v957_v52 = vand.u32 2147483647, %v947_v44 }
 0xe4a   : > { %v960_v54 = vor.u32 1.1754944e-38, %v959_v17  ;;  %vm958_vm10 = vcmp.eq.f32.partialorder %v957_v52, 8.507059e+37  ;;  %v788_v17 = vsel %vm440_vm8, %v1717_v23, 0.0 }
 0xe4c   : > { %429 = vperm.xlu0 %1314, %v395_v41  }
 0xe4e   : > { %v1371_v45 = vpop.eup %1370 }
 0xe4f   : > { %v949_v46 = vmul.f32 %v1371_v45, %v947_v44  ;;  %vm954_vm7 = vweird.f32 %v1371_v45 }
 0xe50   : > { %vm955_vm9 = vmor %vm953_vm0, %vm954_vm7 }
 0xe51   : > { %v950_v47 = vsub.f32 1.0, %v949_v46 }
 0xe53   : > { %v951_v48 = vmul.f32 %v1371_v45, %v950_v47 }
 0xe55   : > { %v952_v50 = vadd.f32 %v1371_v45, %v951_v48 }
 0xe57   : > { %v956_v53 = vsel %vm955_vm9, %v1371_v45, %v952_v50 }
 0xe58   : > { %v961_v56 = vsel %vm958_vm10, %v960_v54, %v956_v53 }
 0xe59   : > { %v964_v61 = vmul.f32 %v961_v56, %v917_v60 }
 0xeb6   : > { %v967_v55 = vpop.permute.xlu0 %966 }
 0xeb7   : > { %v969_v58 = vmul.f32 %v967_v55, %v961_v56 }
 0xeb9   : > { %971 = vrot.lane.b32.xlu1 %v969_v58, %s1447_s14 }
 0xebe   : > { %v430_v3 = vpop.permute.xlu0 %429 }
 0xebf   : > { %vm443_vm12 = vcmp.ne.f32.partialorder %v430_v3, 0.0 }
 0xf2b   : > { %v972_v62 = vpop.permute.xlu1 %971 }
 0xf2c   : > { %v974_v63 = vadd.f32 %v972_v62, %v964_v61 }
 0xf2e   : > { %1372 = vtanh.f32 %v974_v63  ;;  %v982_v34 = vsel %vm443_vm12, %v974_v63, %v917_v60 }
 0xf34   : > { %v1373_v1 = vpop.eup %1372 }
 0xf35   : > { %977 = vrot.lane.b32.xlu2 %v1373_v1, %s1446_s9 }
 0xf8f   : > { %v978_v5 = vpop.permute.xlu2 %977 }
 0xf90   : > { %v980_v7 = vmul.f32 %v978_v5, %v961_v56 }
 0xf92   : > { %v981_v9 = vsel %vm443_vm12, %v980_v7, %v916_v33  ;;  %v983_v16 = vsel %vm443_vm12, %v980_v7, 0.0  ;;  %v918_v33 = vsel %vm442_vm5, %v1754_v32, 0.0 }
 0xf93   : > { %985 = vrot.lane.b32.xlu1 %v981_v9, %s1447_s14 }
 0xf9b   : > { %1052 = vrot.lane.b32.xlu1 %v658_v10, %s1446_s9 }
0x1005   : > { %v986_v11 = vpop.permute.xlu1 %985 }
0x1006   : > { %1255 = vmatmul.msk.f32.vlgmr.msra.gmra.mxu2 %vm525_vm1, %v986_v11 }
0x100d   : > { %v1053_v32 = vpop.permute.xlu1 %1052 }
0x1089   : > { %v1006_v13 = vpop.f32.mrf.mxu2 }
0x108a   : > { %v1007_v15 = vadd.f32 %v1006_v13, %v523_v12 }
0x108c   : > { %1374 = vtanh.f32 %v1007_v15  ;;  %v1256_v2 = vmul.f32 -1.442695, %v1007_v15 }
0x108e   : > { %1376 = vpow2.f32 %v1256_v2 }
0x1092   : > { %v1375_v0 = vpop.eup %1374 }
0x1093   : > { %1031 = vrot.lane.b32.xlu2 %v1375_v0, %s1446_s9 }
0x1094   : > { %v1377_v8 = vpop.eup %1376 }
0x1095   : > { %v1012_v18 = vadd.f32 1.0, %v1377_v8 }
0x1097   : > { %1378 = vrcp.f32 %v1012_v18  ;;  %v1024_v25 = vand.u32 2147483648, %v1012_v18  ;;  %vm1018_vm14 = vweird.f32 %v1012_v18  ;;  %v1022_v57 = vand.u32 2147483647, %v1012_v18 }
0x1099   : > { %v1025_v26 = vor.u32 1.1754944e-38, %v1024_v25  ;;  %vm1023_vm15 = vcmp.eq.f32.partialorder %v1022_v57, 8.507059e+37 }
0x109b   : > { %434 = vperm.xlu2 %1312, %v396_v6  }
0x109d   : > { %v1379_v4 = vpop.eup %1378 }
0x109e   : > { %v1014_v19 = vmul.f32 %v1379_v4, %v1012_v18  ;;  %vm1019_vm11 = vweird.f32 %v1379_v4 }
0x109f   : > { %vm1020_vm13 = vmor %vm1018_vm14, %vm1019_vm11 }
0x10a0   : > { %v1015_v20 = vsub.f32 1.0, %v1014_v19 }
0x10a2   : > { %v1016_v22 = vmul.f32 %v1379_v4, %v1015_v20 }
0x10a3   : > { %1060 = vrot.lane.b32.xlu2 %v853_v14, %s1447_s14 }
0x10a4   : > { %v1017_v24 = vadd.f32 %v1379_v4, %v1016_v22 }
0x10a6   : > { %v1021_v59 = vsel %vm1020_vm13, %v1379_v4, %v1017_v24 }
0x10a7   : > { %v1026_v28 = vsel %vm1023_vm15, %v1025_v26, %v1021_v59 }
0x10a8   : > { %v1029_v35 = vmul.f32 %v1026_v28, %v982_v34 }
0x10ab   : > { %1068 = vrot.lane.b32.xlu2 %v983_v16, %s1449_s13 }
0x10ed   : > { %v1032_v27 = vpop.permute.xlu2 %1031 }
0x10ee   : > { %v1034_v29 = vmul.f32 %v1032_v27, %v1026_v28 }
0x10f0   : > { %1036 = vrot.lane.b32.xlu0 %v1034_v29, %s1447_s14 }
0x10f5   : > { %v435_v40 = vpop.permute.xlu2 %434 }
0x10f6   : > { %vm444_vm4 = vcmp.ne.f32.partialorder %v435_v40, 0.0 }
0x10f8   : > { %1048 = vrot.lane.b32.xlu0 %v593_v31, %s1447_s14 }
0x10fd   : > { %v1061_v41 = vpop.permute.xlu2 %1060 }
0x1100   : > { %1064 = vrot.lane.b32.xlu0 %v918_v33, %s1446_s9 }
0x1105   : > { %v1069_v46 = vpop.permute.xlu2 %1068 }
0x1162   : > { %v1037_v36 = vpop.permute.xlu0 %1036 }
0x1163   : > { %v1039_v38 = vadd.f32 %v1037_v36, %v1029_v35 }
0x1165   : > { %1380 = vtanh.f32 %v1039_v38 }
0x116a   : > { %v1049_v30 = vpop.permute.xlu0 %1048 }
0x116b   : > { %v1381_v39 = vpop.eup %1380  ;;  %v1071_v48 = vsel %vm525_vm1, %v1049_v30, %v1053_v32 }
0x116c   : > { %1042 = vrot.lane.b32.xlu1 %v1381_v39, %s1446_s9  ;;  %s1097_s9 = sshll.u32 %s1093_s21, 4  ;;  %s1098_s9 = int_to_ptr.hbm [resolvable:$true] %s1097_s9 }
0x116d   : > { %s1396_s14 = sshra.s32 %s1098_s9, 4  ;;  %s1397_s14 = int_to_ptr.hbm [resolvable:$true] %s1396_s14 }
0x116e   : > { %s1398_s15 = scalar_lea.hbm %s1397_s14, 16  ;;  %p1403_p0 = scmp.lt.s32.totalorder %s1397_s14, %s1850_s7 }
0x116f   : > { %p1399_p11 = scmp.ne.s32.totalorder %s1397_s14, %s1398_s15 }
0x1171   : > { %p1400_p12 = pnand %p1399_p11, %p1528_p5 }
0x1172   : > { %v1065_v42 = vpop.permute.xlu0 %1064 }
0x1173   : > { %v1076_v43 = vsel %vm525_vm1, %v1061_v41, %v1065_v42  ;;  %p1401_p13 = pneg %p1400_p12 }
0x1174   : > { %1056 = vrot.lane.b32.xlu1 %v723_v37, %s1449_s13  ;;  %v1077_v49 = vsel %vm1072_vm6, %v1076_v43, %v1069_v46  ;;  %s1402_s13 = scalar_lea.hbm %s1850_s7, 32 }
0x1175   : > { %p1404_p1 = scmp.lt.s32.totalorder %s1402_s13, %s1398_s15 }
0x1177   : > { %p1405_p2 = por %p1404_p1, %p1403_p0 }
0x1179   : > { %p1406_p3 = pnand %p1405_p2, %p1401_p13 }
0x11de   : > { %v1043_v44 = vpop.permute.xlu1 %1042 }
0x11df   : > { %v1045_v45 = vmul.f32 %v1043_v44, %v1026_v28 }
0x11e1   : > { %v1046_v51 = vsel %vm444_vm4, %v1045_v45, 0.0 }
0x11e2   : > { %v1078_v47 = vsel %vm1074_vm3, %v1077_v49, %v1046_v51 }
0x11e3   : > { %1080 = vst [vmem:[%s349_s23 + $0x8] sm:$0xff] %v1078_v47 }
0x11e6   : > { %v1057_v50 = vpop.permute.xlu1 %1056 }
0x11e7   : > { %v1073_v52 = vsel %vm1072_vm6, %v1071_v48, %v1057_v50 }
0x11e8   : > { %v1075_v53 = vsel %vm1074_vm3, %v1073_v52, %v788_v17 }
0x11e9   : > { %1079 = vst [vmem:[%s349_s23] sm:$0xff] %v1075_v53 }
0x11ea   : > { %1409 = shalt.err (!%p1406_p3)
}
0x11eb   : > { %1269 = dma.vmem_to_hbm [thread:$0]  (%p1528_p5), %s1096_s29, 256, %s1098_s9, %s1082_s28  }
0x11ec PF: > { %p1275_p4 = scmp.ge.s32.totalorder %s1444_s27, 2  ;;  %s1109_s22 = sand.u32 1, %s1432_s24  }
0x11ed   : > { %s1110_s18 = scalar_lea.sflag [#allocation3], %s1109_s22 }
0x11ee   : > { %p1272_p7 = pnand %p1275_p4, %p1532_p6 }
0x11f0   : > { %p1273_p8 = pneg %p1272_p7 }
0x11f2   : > { %1427 = dma.done.wait (%p1273_p8), %s1110_s18, 256  }
0x11f3   : > { %1429 = vsyncadd (%p1273_p8), %s1110_s18, 4294967040  ;;  %p17_p9 = scmp.ge.s32.totalorder %s1515_s30, 4   ;;  %s1853_s24 = smov %s1436_s25 }
0x11f4   : > { %s1854_s25 = smov %s1440_s26  ;;  %s1855_s26 = smov %s1526_s10 }
0x11f5   : > { %s1856_s27 = smov %s1515_s30  ;;  %19 = sbr.rel (!%p17_p9) target bundleno = 3 (0x3), region = 101 }
0x11fa   :  { %1116 = vsyncpa [#allocation3], 1 }
0x11fb   :  { %1118 = vsyncpa [#allocation3 + $0x1], 1 }

</bundles_post_ra>
